<compile_context>
chip_gen: v6e
topology: v6e:2x2x1
jax: 0.10.0
libtpu: 0.0.40
codegen_flags: <defaults>
</compile_context>

<pallas_src>
import jax
import jax.numpy as jnp
from jax.experimental import pallas as pl
from jax.experimental.pallas import tpu as pltpu

BATCH = 2
SEQ = 8
DIM = 32
HIDDEN_DIM = 64


def ffn_kernel(x_ref, w13_ref, w2_ref, o_ref):
    """SwiGLU FFN: o = (silu(x @ w1) * (x @ w3)) @ w2.

    x_ref  : (B*S, D)   activations, batch folded onto sublanes
    w13_ref: (D, 2*H)   [w1 | w3] fused, lane-dense (128 lanes)
    w2_ref : (H, D)
    o_ref  : (B*S, D)
    """
    x = x_ref[...]
    # Single fused gate/up projection -> exactly 128 output lanes (one MXU issue).
    gu = jnp.dot(x, w13_ref[...], preferred_element_type=jnp.float32)
    gate = gu[:, :HIDDEN_DIM]
    up = gu[:, HIDDEN_DIM:]
    h = jax.nn.silu(gate) * up                      # f32 VPU/EUP math
    o_ref[...] = jnp.dot(h, w2_ref[...],
                         preferred_element_type=jnp.float32).astype(o_ref.dtype)


def feed_forward(x, w1, w2, w3):
    """x: (B, S, D). Weights in PyTorch nn.Linear layout (out_features, in_features)."""
    B, S, D = x.shape
    H = w1.shape[0]
    # Host-side packing: pre-transpose to (in, out) and fuse w1/w3 into one
    # (D, 2H) = (32, 128) weight so the gate/up matmul is a single lane-dense
    # MXU matmul.
    w13 = jnp.concatenate([w1.T, w3.T], axis=1)     # (D, 2H)
    w2t = w2.T                                       # (H, D)
    # Collapse batch onto sublanes: one grid-less invocation, one output DMA.
    x2d = x.reshape(B * S, D)

    out2d = pl.pallas_call(
        ffn_kernel,
        out_shape=jax.ShapeDtypeStruct((B * S, D), x.dtype),
        in_specs=[
            pl.BlockSpec(memory_space=pltpu.MemorySpace.VMEM),
            pl.BlockSpec(memory_space=pltpu.MemorySpace.VMEM),
            pl.BlockSpec(memory_space=pltpu.MemorySpace.VMEM),
        ],
        out_specs=pl.BlockSpec(memory_space=pltpu.MemorySpace.VMEM),
    )(x2d, w13, w2t)
    return out2d.reshape(B, S, D)


# ------------------------ pure-JAX reference ------------------------
def reference(x, w1, w2, w3):
    hp = jax.lax.Precision.HIGHEST
    g = jnp.einsum('bsd,hd->bsh', x, w1, precision=hp)   # x @ w1.T
    u = jnp.einsum('bsd,hd->bsh', x, w3, precision=hp)   # x @ w3.T
    return jnp.einsum('bsh,dh->bsd', jax.nn.silu(g) * u, w2, precision=hp)


if __name__ == "__main__":
    key = jax.random.PRNGKey(0)
    k1, k2, k3, kx = jax.random.split(key, 4)

    # PyTorch nn.Linear layout: (out_features, in_features), bias=False
    w1 = jax.random.normal(k1, (HIDDEN_DIM, DIM), jnp.float32) / jnp.sqrt(float(DIM))
    w2 = jax.random.normal(k2, (DIM, HIDDEN_DIM), jnp.float32) / jnp.sqrt(float(HIDDEN_DIM))
    w3 = jax.random.normal(k3, (HIDDEN_DIM, DIM), jnp.float32) / jnp.sqrt(float(DIM))
    x = jax.random.normal(kx, (BATCH, SEQ, DIM), jnp.float32)

    out = feed_forward(x, w1, w2, w3)
    out = jax.block_until_ready(out)

    ref = reference(x, w1, w2, w3)
    assert out.shape == (BATCH, SEQ, DIM)
    err = jnp.max(jnp.abs(out - ref))
    assert jnp.allclose(out, ref, atol=1e-4, rtol=1e-4), f"max abs err = {err}"

    print("KERNEL_OK")
</pallas_src>

<mosaic_0001>
module attributes {stable_mosaic.version = 11 : i64} {
  func.func @ffn_kernel(%arg0: memref<16x32xf32, #tpu.memory_space<vmem>>, %arg1: memref<32x128xf32, #tpu.memory_space<vmem>>, %arg2: memref<64x32xf32, #tpu.memory_space<vmem>>, %arg3: memref<16x32xf32, #tpu.memory_space<vmem>>) attributes {dimension_semantics = [], scalar_prefetch = 0 : i64, scratch_operands = 0 : i64, tpu.core_type = #tpu.core_type<tc>} {
    %c0 = arith.constant 0 : index
    %c0_0 = arith.constant 0 : index
    %0 = vector.load %arg0[%c0, %c0_0] : memref<16x32xf32, #tpu.memory_space<vmem>>, vector<16x32xf32>
    %c0_1 = arith.constant 0 : index
    %c0_2 = arith.constant 0 : index
    %1 = vector.load %arg1[%c0_1, %c0_2] : memref<32x128xf32, #tpu.memory_space<vmem>>, vector<32x128xf32>
    %cst = arith.constant dense<0.000000e+00> : vector<16x128xf32>
    %2 = tpu.matmul %0, %1, %cst {dimension_numbers = #tpu.dot_dimension_numbers<[1], [0], [0], [1], [0, 0, 1, 1], [], []>} : vector<16x32xf32>, vector<32x128xf32>, vector<16x128xf32> -> vector<16x128xf32>
    %3 = vector.extract_strided_slice %2 {offsets = [0, 0], sizes = [16, 64], strides = [1, 1]} : vector<16x128xf32> to vector<16x64xf32>
    %4 = vector.extract_strided_slice %2 {offsets = [0, 64], sizes = [16, 64], strides = [1, 1]} : vector<16x128xf32> to vector<16x64xf32>
    %5 = arith.negf %3 : vector<16x64xf32>
    %6 = math.exp %5 : vector<16x64xf32>
    %cst_3 = arith.constant 1.000000e+00 : f32
    %7 = vector.broadcast %cst_3 : f32 to vector<16x64xf32>
    %8 = arith.addf %7, %6 : vector<16x64xf32>
    %9 = arith.divf %7, %8 : vector<16x64xf32>
    %10 = arith.mulf %3, %9 : vector<16x64xf32>
    %11 = arith.mulf %10, %4 : vector<16x64xf32>
    %c0_4 = arith.constant 0 : index
    %c0_5 = arith.constant 0 : index
    %12 = vector.load %arg2[%c0_4, %c0_5] : memref<64x32xf32, #tpu.memory_space<vmem>>, vector<64x32xf32>
    %cst_6 = arith.constant dense<0.000000e+00> : vector<16x32xf32>
    %13 = tpu.matmul %11, %12, %cst_6 {dimension_numbers = #tpu.dot_dimension_numbers<[1], [0], [0], [1], [0, 0, 1, 1], [], []>} : vector<16x64xf32>, vector<64x32xf32>, vector<16x32xf32> -> vector<16x32xf32>
    %c0_7 = arith.constant 0 : index
    %c0_8 = arith.constant 0 : index
    %14 = vector.load %arg3[%c0_7, %c0_8] : memref<16x32xf32, #tpu.memory_space<vmem>>, vector<16x32xf32>
    tpu.vector_store %arg3[%c0_7, %c0_8], %13 {strides = array<i32>} : memref<16x32xf32, #tpu.memory_space<vmem>>, vector<16x32xf32>,
    return
  }
}

</mosaic_0001>

<bundles_post_ra>
// kernel: tpu_custom_call.1
= control target key start
LH: loop header
LB: loop body
LE: loop exit
PB: predicated region body
PF: predicated region fallthrough
CT: control target
= control target key end

     0   :  { %vm21_vm0 = vcmask 261120   ;;  %s394_s0 = inlined_call_operand.vmem [shape: f32[16,32], index: 0, kind: input, shape index: {}]   ;;  %s395_s1 = inlined_call_operand.vmem [shape: f32[32,128], index: 1, kind: input, shape index: {}]   ;;  %s396_s2 = inlined_call_operand.vmem [shape: f32[64,32], index: 2, kind: input, shape index: {}]   ;;  %s397_s3 = inlined_call_operand.hbm [shape: f32[16,32], index: 3, kind: output, shape index: {}]  }
   0x1   :  { %v20_v0 = vld [vmem:[%s395_s1 + $0x18] sm:$0xff]  ;;  %v19_v1 = vld [vmem:[%s395_s1 + $0x10] sm:$0xff]  ;;  %v15_v2 = vld [vmem:[%s394_s0] sm:$0xff] }
   0x2   :  { %257 = vmatprep.subr.mxu0 %v20_v0  ;;  %v18_v3 = vld [vmem:[%s395_s1 + $0x8] sm:$0xff]  ;;  %265 = vmatprep.mubr.msk.f32.mxu0 %vm21_vm0, %v15_v2 }
   0x3   :  { %258 = vmatpush3.msra.mxu0 %v20_v0 }
   0x4   :  { %8 = vsyncpa [#allocation3], 0  ;;  %259 = vmatprep.subr.mxu0 %v19_v1  ;;  %v17_v4 = vld [vmem:[%s395_s1] sm:$0xff]  ;;  %v16_v5 = vld [vmem:[%s394_s0 + $0x8] sm:$0xff]  ;;  %s321_s11 = smov 64   ;;  %vm135_vm1 = vcmask 523264  }
   0x5   :  { %260 = vmatpush3.msra.mxu0 %v19_v1  ;;  %v134_v6 = vld [vmem:[%s396_s2 + $0x38] sm:$0xff]  ;;  %v133_v7 = vld [vmem:[%s396_s2 + $0x30] sm:$0xff]  ;;  %v132_v8 = vld [vmem:[%s396_s2 + $0x28] sm:$0xff] }
   0x6   :  { %261 = vmatprep.subr.mxu0 %v18_v3  ;;  %268 = vmatprep.subr.mxu1 %v134_v6  ;;  %v131_v9 = vld [vmem:[%s396_s2 + $0x20] sm:$0xff]  ;;  %v130_v10 = vld [vmem:[%s396_s2 + $0x18] sm:$0xff]  ;;  %v129_v11 = vld [vmem:[%s396_s2 + $0x10] sm:$0xff] }
   0x7   :  { %262 = vmatpush3.msra.mxu0 %v18_v3  ;;  %269 = vmatpush3.msra.mxu1 %v134_v6  ;;  %v128_v12 = vld [vmem:[%s396_s2 + $0x8] sm:$0xff]  ;;  %v127_v13 = vld [vmem:[%s396_s2] sm:$0xff]  ;;  %s322_s2 = smov [#allocation2]  }
   0x8   :  { %263 = vmatprep.subr.mxu0 %v17_v4  ;;  %270 = vmatprep.subr.mxu1 %v133_v7  ;;  %s224_s12 = sshll.u32 %s322_s2, 4  ;;  %s225_s12 = int_to_ptr.vmem [resolvable:$true] %s224_s12 }
   0x9   :  { %264 = vmatpush3.msra.mxu0 %v17_v4  ;;  %271 = vmatpush3.msra.mxu1 %v133_v7  ;;  %s299_s13 = scalar_lea.vmem %s225_s12, 256  ;;  %p304_p1 = scmp.lt.s32.totalorder %s225_s12, %s225_s12 }
   0xa   :  { %266 = vmatmul.mubr.msk.f32.vlgmr.msra.gmra.mxu0 %vm21_vm0, %v16_v5  ;;  %272 = vmatprep.subr.mxu1 %v132_v8  ;;  %p300_p0 = scmp.ne.s32.totalorder %s225_s12, %s299_s13  ;;  %p305_p2 = scmp.lt.s32.totalorder %s299_s13, %s299_s13 }
   0xb   :  { %273 = vmatpush3.msra.mxu1 %v132_v8 }
   0xc   :  { %274 = vmatprep.subr.mxu1 %v131_v9  ;;  %p306_p3 = por %p305_p2, %p304_p1 }
   0xd   :  { %275 = vmatpush3.msra.mxu1 %v131_v9 }
   0xe   :  { %276 = vmatprep.subr.mxu1 %v130_v10  ;;  %p307_p4 = pnand %p306_p3, %p300_p0 }
   0xf   :  { %277 = vmatpush3.msra.mxu1 %v130_v10 }
  0x10   :  { %278 = vmatprep.subr.mxu1 %v129_v11 }
  0x11   :  { %279 = vmatpush3.msra.mxu1 %v129_v11 }
  0x12   :  { %280 = vmatprep.subr.mxu1 %v128_v12 }
  0x13   :  { %281 = vmatpush3.msra.mxu1 %v128_v12 }
  0x14   :  { %282 = vmatprep.subr.mxu1 %v127_v13 }
  0x15   :  { %283 = vmatpush3.msra.mxu1 %v127_v13 }
  0xca   :  { %v267_v14 = vpop.f32.mrf.mxu0 }
  0xcb   :  { %v238_v17 = vmul.f32 -1.442695, %v267_v14 }
  0xcc   :  { %v94_v15 = vpop.f32.mrf.mxu0 }
  0xcd   :  { %119 = vrot.lane.b32.xlu0 %v94_v15, %s321_s11  ;;  %v237_v16 = vmul.f32 -1.442695, %v94_v15 }
  0xcf   :  { %291 = vpow2.f32 %v237_v16 }
  0xd0   :  { %293 = vpow2.f32 %v238_v17 }
  0xd1   :  { %121 = vrot.lane.b32.xlu0 %v267_v14, %s321_s11 }
  0xdc   :  { %v292_v18 = vpop.eup %291 }
  0xdd   :  { %v109_v19 = vadd.f32 1.0, %v292_v18  ;;  %v294_v20 = vpop.eup %293 }
  0xde   :  { %v110_v21 = vadd.f32 1.0, %v294_v20 }
  0xdf   :  { %295 = vrcp.f32 %v109_v19 }
  0xe0   :  { %297 = vrcp.f32 %v110_v21 }
  0xec   :  { %v296_v22 = vpop.eup %295 }
  0xed   :  { %v115_v23 = vmul.f32 %v296_v22, %v94_v15  ;;  %v298_v24 = vpop.eup %297 }
  0xee   :  { %v116_v27 = vmul.f32 %v298_v24, %v267_v14 }
 0x13f   :  { %v120_v25 = vpop.permute.xlu0 %119 }
 0x140   :  { %v125_v26 = vmul.f32 %v120_v25, %v115_v23 }
 0x142   :  { %284 = vmatprep.mubr.msk.f32.mxu1 %vm135_vm1, %v125_v26 }
 0x143   :  { %v122_v28 = vpop.permute.xlu0 %121 }
 0x144   :  { %v126_v29 = vmul.f32 %v122_v28, %v116_v27 }
 0x146   :  { %285 = vmatmul.mubr.msk.f32.vlgmr.msra.gmra.mxu1 %vm135_vm1, %v126_v29 }
 0x206   :  { %v286_v30 = vpop.f32.mrf.mxu1 }
 0x207   :  { %218 = vst.msk [vmem:[#allocation2 + $0x8] sm:$0xff] %vm21_vm0, %v286_v30 }
 0x208   :  { %v208_v31 = vpop.f32.mrf.mxu1 }
 0x209   :  { %217 = vst.msk [vmem:[#allocation2] sm:$0xff] %vm21_vm0, %v208_v31 }
 0x20a   :  { %310 = shalt.err (!%p307_p4)
}
 0x20b   :  { %s323_s14 = smov 128   ;;  %s324_s15 = smov 8  }
 0x20c   :  { %230 = dma.vmem_to_hbm [thread:$0]  %s225_s12, 256, %s397_s3, [#allocation3], %s323_s14, %s323_s14, %s324_s15  }
 0x20d   :  { %319 = dma.done.wait [#allocation3], 256  }
 0x20e   :  { %320 = vsyncadd [#allocation3], 4294967040 }
 0x20f   :  { %234 = vsyncpa [#allocation3], 1 }

</bundles_post_ra>
